<compile_context>
chip_gen: v7x
topology: tpu7x:2x2x1
jax: 0.10.0
libtpu: 0.0.40
codegen_flags: <defaults>
</compile_context>

<pallas_src>
from typing import NamedTuple

import jax
import jax.numpy as jnp
from jax.experimental import pallas as pl
from jax.experimental.pallas import tpu as pltpu


def _round_up(n, m):
    return ((n + m - 1) // m) * m


class PolicyNetParams(NamedTuple):
    w1p: jax.Array   # (n_states, H)  f32
    b1p: jax.Array   # (1, H)         f32
    w2p: jax.Array   # (H, A)         f32
    b2p: jax.Array   # (1, A)         f32, padded action lanes hold -1e30
    n_actions: int


def prepare_params(w1, b1, w2, b2):
    """One-time padding / layout prep (hoisted out of the per-call hot path).

    Pads hidden/action dims to multiples of 128 so the in-kernel intermediates
    (h, logits) are lane-dense. Zero padding of w1/b1/w2 is exact (tanh(0)=0
    hidden units contribute nothing). The action mask is folded into the padded
    bias: padded logit lanes become exactly -1e30, so exp() of them is 0 and
    the softmax over the real actions is unchanged.
    """
    n_states, n_hiddens = w1.shape
    n_actions = w2.shape[1]

    b1 = jnp.reshape(b1, (1, n_hiddens)).astype(jnp.float32)
    b2 = jnp.reshape(b2, (1, n_actions)).astype(jnp.float32)

    H = _round_up(max(n_hiddens, 128), 128)
    A = _round_up(max(n_actions, 128), 128)

    w1p = jnp.zeros((n_states, H), jnp.float32).at[:, :n_hiddens].set(w1)
    b1p = jnp.zeros((1, H), jnp.float32).at[:, :n_hiddens].set(b1)
    w2p = jnp.zeros((H, A), jnp.float32).at[:n_hiddens, :n_actions].set(w2)
    b2p = jnp.full((1, A), -1e30, jnp.float32).at[:, :n_actions].set(b2)

    return PolicyNetParams(w1p, b1p, w2p, b2p, n_actions)


def policy_net_kernel(x_ref, w1_ref, b1_ref, w2_ref, b2_ref, o_ref):
    # One batch tile per grid step. Weights/biases have constant index maps so
    # they stay resident in VMEM across grid steps (no re-DMA). Each step:
    # MXU matmul -> tanh -> MXU matmul -> numerically stable softmax. Padded
    # action lanes already carry -1e30 via the folded bias, so no in-kernel
    # mask is needed and their exp() contribution is exactly zero.
    x = x_ref[...]  # (tm, n_states) f32

    # fcl1 + tanh
    h = jnp.tanh(
        jnp.dot(x, w1_ref[...], preferred_element_type=jnp.float32) + b1_ref[...]
    )

    # fcl2 (lane-dense, padded action dim; padded lanes == -1e30)
    logits = jnp.dot(h, w2_ref[...], preferred_element_type=jnp.float32) + b2_ref[...]

    # Numerically stable softmax. denom is (tm, 1): exact reciprocal is a
    # handful of ops and keeps rows summing to 1 to full precision.
    m = jnp.max(logits, axis=-1, keepdims=True)
    e = jnp.exp(logits - m)
    denom = jnp.sum(e, axis=-1, keepdims=True)
    inv = pl.reciprocal(denom)  # exact (approx=False)

    # Store only the real action columns -> narrow, contiguous HBM writeback.
    n_actions = o_ref.shape[-1]
    o_ref[...] = (e[:, :n_actions] * inv).astype(o_ref.dtype)
    # TODO(synk): optional n_actions==2 specialization (sigmoid of the logit
    # difference) would drop the cross-lane max/sum entirely on v5e.


def _choose_batch_tiling(B, tm_max):
    # Pad B to a multiple of 8 first, then split into the fewest tiles that fit
    # under tm_max, sizing the tile to the work so padding waste stays small.
    B8 = _round_up(B, 8)
    nt = (B8 + tm_max - 1) // tm_max
    tm = _round_up((B8 + nt - 1) // nt, 8)   # <= tm_max since tm_max % 8 == 0
    Bp = nt * tm
    return tm, Bp, nt


def policy_net_forward(x, params: PolicyNetParams, *, tm_max=2048):
    """softmax(tanh(x @ w1 + b1) @ w2 + b2, axis=-1) with pre-padded params.

    x      : (B, n_states) f32
    params : PolicyNetParams from prepare_params()
    Returns (B, n_actions) f32.
    """
    w1p, b1p, w2p, b2p, n_actions = params
    B, n_states = x.shape
    H = w1p.shape[1]
    A = w2p.shape[1]

    tm, Bp, nt = _choose_batch_tiling(B, tm_max)
    xp = x if Bp == B else jnp.zeros((Bp, n_states), x.dtype).at[:B].set(x)
    grid = (nt,)

    flops = 2 * Bp * n_states * H + 2 * Bp * H * A
    bytes_accessed = 4 * (
        Bp * n_states + n_states * H + H + H * A + A + Bp * n_actions
    )

    out = pl.pallas_call(
        policy_net_kernel,
        out_shape=jax.ShapeDtypeStruct((Bp, n_actions), jnp.float32),
        grid=grid,
        in_specs=[
            pl.BlockSpec((tm, n_states), lambda i: (i, 0)),  # x: tiled over batch
            pl.BlockSpec((n_states, H), lambda i: (0, 0)),   # w1: resident
            pl.BlockSpec((1, H), lambda i: (0, 0)),          # b1: resident
            pl.BlockSpec((H, A), lambda i: (0, 0)),          # w2: resident
            pl.BlockSpec((1, A), lambda i: (0, 0)),          # b2: resident (masked)
        ],
        # Narrow output: block spans the full action dim, so the HBM DMA stays
        # contiguous while writing only n_actions columns per row.
        out_specs=pl.BlockSpec((tm, n_actions), lambda i: (i, 0)),
        compiler_params=pltpu.CompilerParams(
            # Batch tiles are independent; multi-tile grids may split across
            # v7x's two TensorCores, harmless elsewhere / for grid==1.
            dimension_semantics=("parallel",),
        ),
        cost_estimate=pl.CostEstimate(
            flops=flops,
            transcendentals=Bp * (H + A + 1),
            bytes_accessed=bytes_accessed,
        ),
    )(xp, w1p, b1p, w2p, b2p)

    return out[:B] if Bp != B else out


def init_params(key, n_states, n_hiddens, n_actions):
    # Deterministic synthetic init (mimics torch.nn.Linear's U(-1/sqrt(fan_in), ...)).
    k1, k2, k3, k4 = jax.random.split(key, 4)
    s1 = 1.0 / jnp.sqrt(jnp.float32(n_states))
    s2 = 1.0 / jnp.sqrt(jnp.float32(n_hiddens))
    w1 = jax.random.uniform(k1, (n_states, n_hiddens), jnp.float32, -s1, s1)
    b1 = jax.random.uniform(k2, (1, n_hiddens), jnp.float32, -s1, s1)
    w2 = jax.random.uniform(k3, (n_hiddens, n_actions), jnp.float32, -s2, s2)
    b2 = jax.random.uniform(k4, (1, n_actions), jnp.float32, -s2, s2)
    return w1, b1, w2, b2


if __name__ == "__main__":
    # Typical policy-gradient sizes (e.g. CartPole): 4 states, 2 actions, 10 hidden.
    B, n_states, n_hiddens, n_actions = 8, 4, 10, 2

    key = jax.random.PRNGKey(0)
    kx, kp = jax.random.split(key)
    x = jax.random.normal(kx, (B, n_states), dtype=jnp.float32)
    w1, b1, w2, b2 = init_params(kp, n_states, n_hiddens, n_actions)

    # One-time param prep (padding + folded action mask), then forward.
    params = prepare_params(w1, b1, w2, b2)
    out = policy_net_forward(x, params)
    out = jax.block_until_ready(out)

    # Sanity check against a pure-JAX reference of the same forward pass.
    ref = jax.nn.softmax(jnp.tanh(x @ w1 + b1) @ w2 + b2, axis=-1)
    assert out.shape == (B, n_actions), "output shape mismatch"
    assert jnp.allclose(out, ref, atol=1e-5, rtol=1e-5), "mismatch vs reference"
    assert jnp.allclose(jnp.sum(out, axis=-1), 1.0, atol=1e-5), "softmax rows must sum to 1"

    print("KERNEL_OK")
</pallas_src>

<mosaic_0001>
module attributes {stable_mosaic.version = 11 : i64} {
  func.func @policy_net_kernel(%arg0: i32, %arg1: memref<8x4xf32, #tpu.memory_space<vmem>>, %arg2: memref<4x128xf32, #tpu.memory_space<vmem>>, %arg3: memref<1x128xf32, #tpu.memory_space<vmem>>, %arg4: memref<128x128xf32, #tpu.memory_space<vmem>>, %arg5: memref<1x128xf32, #tpu.memory_space<vmem>>, %arg6: memref<8x2xf32, #tpu.memory_space<vmem>>) attributes {dimension_semantics = [#tpu.dimension_semantics<parallel>], iteration_bounds = array<i64: 1>, scalar_prefetch = 0 : i64, scratch_operands = 0 : i64, tpu.core_type = #tpu.core_type<tc>, window_params = [{transform_indices = @transform_0, window_bounds = array<i64: 8, 4>}, {pipeline_mode = #tpu.pipeline_mode<synchronous>, transform_indices = @transform_1, window_bounds = array<i64: 4, 128>}, {pipeline_mode = #tpu.pipeline_mode<synchronous>, transform_indices = @transform_2, window_bounds = array<i64: 1, 128>}, {pipeline_mode = #tpu.pipeline_mode<synchronous>, transform_indices = @transform_3, window_bounds = array<i64: 128, 128>}, {pipeline_mode = #tpu.pipeline_mode<synchronous>, transform_indices = @transform_4, window_bounds = array<i64: 1, 128>}, {transform_indices = @transform_5, window_bounds = array<i64: 8, 2>}]} {
    %c0 = arith.constant 0 : index
    %c0_0 = arith.constant 0 : index
    %0 = vector.load %arg1[%c0, %c0_0] : memref<8x4xf32, #tpu.memory_space<vmem>>, vector<8x4xf32>
    %c0_1 = arith.constant 0 : index
    %c0_2 = arith.constant 0 : index
    %1 = vector.load %arg2[%c0_1, %c0_2] : memref<4x128xf32, #tpu.memory_space<vmem>>, vector<4x128xf32>
    %cst = arith.constant dense<0.000000e+00> : vector<8x128xf32>
    %2 = tpu.matmul %0, %1, %cst {dimension_numbers = #tpu.dot_dimension_numbers<[1], [0], [0], [1], [0, 0, 1, 1], [], []>} : vector<8x4xf32>, vector<4x128xf32>, vector<8x128xf32> -> vector<8x128xf32>
    %c0_3 = arith.constant 0 : index
    %c0_4 = arith.constant 0 : index
    %3 = vector.load %arg3[%c0_3, %c0_4] : memref<1x128xf32, #tpu.memory_space<vmem>>, vector<1x128xf32>
    %4 = vector.broadcast %3 : vector<1x128xf32> to vector<8x128xf32>
    %5 = arith.addf %2, %4 : vector<8x128xf32>
    %6 = math.tanh %5 : vector<8x128xf32>
    %c0_5 = arith.constant 0 : index
    %c0_6 = arith.constant 0 : index
    %7 = vector.load %arg4[%c0_5, %c0_6] : memref<128x128xf32, #tpu.memory_space<vmem>>, vector<128x128xf32>
    %cst_7 = arith.constant dense<0.000000e+00> : vector<8x128xf32>
    %8 = tpu.matmul %6, %7, %cst_7 {dimension_numbers = #tpu.dot_dimension_numbers<[1], [0], [0], [1], [0, 0, 1, 1], [], []>} : vector<8x128xf32>, vector<128x128xf32>, vector<8x128xf32> -> vector<8x128xf32>
    %c0_8 = arith.constant 0 : index
    %c0_9 = arith.constant 0 : index
    %9 = vector.load %arg5[%c0_8, %c0_9] : memref<1x128xf32, #tpu.memory_space<vmem>>, vector<1x128xf32>
    %10 = vector.broadcast %9 : vector<1x128xf32> to vector<8x128xf32>
    %11 = arith.addf %8, %10 : vector<8x128xf32>
    %cst_10 = arith.constant dense<0xFF800000> : vector<8xf32>
    %12 = vector.multi_reduction <maximumf>, %11, %cst_10 [1] : vector<8x128xf32> to vector<8xf32>
    %13 = vector.shape_cast %12 : vector<8xf32> to vector<8x1xf32>
    %14 = vector.broadcast %13 : vector<8x1xf32> to vector<8x128xf32>
    %15 = arith.subf %11, %14 : vector<8x128xf32>
    %16 = math.exp %15 : vector<8x128xf32>
    %cst_11 = arith.constant dense<0.000000e+00> : vector<8xf32>
    %17 = vector.multi_reduction <add>, %16, %cst_11 [1] : vector<8x128xf32> to vector<8xf32>
    %18 = vector.shape_cast %17 : vector<8xf32> to vector<8x1xf32>
    %19 = tpu.reciprocal %18 : vector<8x1xf32> -> vector<8x1xf32>
    %20 = vector.extract_strided_slice %16 {offsets = [0, 0], sizes = [8, 2], strides = [1, 1]} : vector<8x128xf32> to vector<8x2xf32>
    %21 = vector.broadcast %19 : vector<8x1xf32> to vector<8x2xf32>
    %22 = arith.mulf %20, %21 : vector<8x2xf32>
    %c0_12 = arith.constant 0 : index
    %c0_13 = arith.constant 0 : index
    %23 = vector.load %arg6[%c0_12, %c0_13] : memref<8x2xf32, #tpu.memory_space<vmem>>, vector<8x2xf32>
    tpu.vector_store %arg6[%c0_12, %c0_13], %22 {strides = array<i32>} : memref<8x2xf32, #tpu.memory_space<vmem>>, vector<8x2xf32>,
    return
  }
  func.func @transform_0(%arg0: i32) -> (i32, i32) {
    %c0_i32 = arith.constant 0 : i32
    %c0_i32_0 = arith.constant 0 : i32
    return %arg0, %c0_i32 : i32, i32
  }
  func.func @transform_1(%arg0: i32) -> (i32, i32) {
    %c0_i32 = arith.constant 0 : i32
    %c0_i32_0 = arith.constant 0 : i32
    %c0_i32_1 = arith.constant 0 : i32
    return %c0_i32, %c0_i32_0 : i32, i32
  }
  func.func @transform_2(%arg0: i32) -> (i32, i32) {
    %c0_i32 = arith.constant 0 : i32
    %c0_i32_0 = arith.constant 0 : i32
    %c0_i32_1 = arith.constant 0 : i32
    return %c0_i32, %c0_i32_0 : i32, i32
  }
  func.func @transform_3(%arg0: i32) -> (i32, i32) {
    %c0_i32 = arith.constant 0 : i32
    %c0_i32_0 = arith.constant 0 : i32
    %c0_i32_1 = arith.constant 0 : i32
    return %c0_i32, %c0_i32_0 : i32, i32
  }
  func.func @transform_4(%arg0: i32) -> (i32, i32) {
    %c0_i32 = arith.constant 0 : i32
    %c0_i32_0 = arith.constant 0 : i32
    %c0_i32_1 = arith.constant 0 : i32
    return %c0_i32, %c0_i32_0 : i32, i32
  }
  func.func @transform_5(%arg0: i32) -> (i32, i32) {
    %c0_i32 = arith.constant 0 : i32
    %c0_i32_0 = arith.constant 0 : i32
    return %arg0, %c0_i32 : i32, i32
  }
}

</mosaic_0001>

<bundles_post_ra>
// kernel: tpu_custom_call.1
= control target key start
LH: loop header
LB: loop body
LE: loop exit
PB: predicated region body
PF: predicated region fallthrough
CT: control target
= control target key end

     0   :  { %10 = vsyncpa [#allocation3], 0  ;;  %s354_s18 = smov [#allocation2]   ;;  %s417_s0 = inlined_call_operand.vmem [shape: f32[8,4], index: 0, kind: input, shape index: {}]   ;;  %s418_s1 = inlined_call_operand.vmem [shape: f32[4,128], index: 1, kind: input, shape index: {}]   ;;  %s419_s2 = inlined_call_operand.vmem [shape: f32[1,128], index: 2, kind: input, shape index: {}]   ;;  %s420_s3 = inlined_call_operand.hbm [shape: f32[128,128], index: 3, kind: input, shape index: {}]   ;;  %s421_s4 = inlined_call_operand.vmem [shape: f32[1,128], index: 4, kind: input, shape index: {}]   ;;  %s422_s5 = inlined_call_operand.vmem [shape: f32[8,2], index: 5, kind: output, shape index: {}]  }
   0x1   :  { %s22_s19 = sshll.u32 %s354_s18, 4  ;;  %s330_s22 = scalar_lea.hbm %s420_s3, 2048  ;;  %s23_s19 = int_to_ptr.vmem [resolvable:$true] %s22_s19 }
   0x2   :  { %p331_p0 = scmp.ne.s32.totalorder %s420_s3, %s330_s22  ;;  %p334_p1 = scmp.lt.u32.totalorder %s330_s22, %s420_s3 }
   0x4   :  { %p336_p2 = pnand %p334_p1, %p331_p0 }
   0x6   :  { %339 = shalt.err (!%p336_p2)
}
   0x7   :  { %s340_s27 = scalar_lea.vmem %s23_s19, 2048  ;;  %p345_p4 = scmp.lt.s32.totalorder %s23_s19, %s23_s19 }
   0x8   :  { %p341_p3 = scmp.ne.s32.totalorder %s23_s19, %s340_s27  ;;  %p346_p5 = scmp.lt.s32.totalorder %s340_s27, %s340_s27 }
   0xa   :  { %p347_p6 = por %p346_p5, %p345_p4 }
   0xc   :  { %p348_p7 = pnand %p347_p6, %p341_p3 }
   0xe   :  { %351 = shalt.err (!%p348_p7)
}
   0xf   :  { %s355_s28 = smov 128   ;;  %s356_s29 = smov 8  }
  0x10   :  { %28 = dma.hbm_to_vmem [thread:$0]  %s420_s3, 2048, %s23_s19, [#allocation3], %s355_s28, %s355_s28, %s356_s29  }
  0x11   :  { %352 = dma.done.wait [#allocation3], 2048  }
  0x12   :  { %353 = vsyncadd [#allocation3], 4294965248  ;;  %v357_v0 = vmov 0.0   ;;  %vm358_vm0 = vmmov 0   ;;  %v359_v1 = vmov 0.0|0.0   ;;  %vm47_vm1 = vcmask 1043456  }
  0x13   :  { %254 = vmatprep.subr.mxu0 %v357_v0  ;;  %256 = vmatprep.mubr.msk.f32.mxu0 %vm358_vm0, %v357_v0  ;;  %vm43_vm2 = vcmask 31744   ;;  %v35_v2 = vld [vmem:[%s418_s1] sm:$0xf]  ;;  %v123_v5 = vld [vmem:[#allocation2 + $0x8] sm:$0xff]  ;;  %v124_v6 = vld [vmem:[#allocation2 + $0x10] sm:$0xff]  ;;  %vm224_vm3 = vcmask 15360  }
  0x14   :  { %294 = vmatprep.subr.bf16.mxu1 %v359_v1  ;;  %291 = vmatprep.mubr.msk.f32.mxu1 %vm358_vm0, %v357_v0  ;;  %v34_v3 = vld [vmem:[%s417_s0] sm:$0xff]  ;;  %v125_v7 = vld [vmem:[#allocation2 + $0x18] sm:$0xff]  ;;  %v127_v11 = vld [vmem:[#allocation2 + $0x28] sm:$0xff] }
  0x15   :  { %v122_v4 = vld [vmem:[#allocation2] sm:$0xff]  ;;  %255 = vmatpush3.msk.msra.mxu0 %vm47_vm1, %v35_v2  ;;  %v298_v9 = vpack.c.bf16 %v125_v7, %v124_v6  ;;  %v128_v13 = vld [vmem:[#allocation2 + $0x30] sm:$0xff]  ;;  %v129_v14 = vld [vmem:[#allocation2 + $0x38] sm:$0xff] }
  0x16   :  { %257 = vmatmul.mubr.msk.f32.vlgmr.msra.gmra.mrb[0].mxu0 %vm43_vm2, %v34_v3  ;;  %v295_v8 = vpack.c.bf16 %v123_v5, %v122_v4  ;;  %v126_v10 = vld [vmem:[#allocation2 + $0x20] sm:$0xff]  ;;  %v304_v15 = vpack.c.bf16 %v129_v14, %v128_v13  ;;  %v131_v17 = vld [vmem:[#allocation2 + $0x48] sm:$0xff]  ;;  %v132_v19 = vld [vmem:[#allocation2 + $0x50] sm:$0xff] }
  0x17   :  { %v301_v12 = vpack.c.bf16 %v127_v11, %v126_v10  ;;  %v130_v16 = vld [vmem:[#allocation2 + $0x40] sm:$0xff]  ;;  %v133_v20 = vld [vmem:[#allocation2 + $0x58] sm:$0xff]  ;;  %v135_v23 = vld [vmem:[#allocation2 + $0x68] sm:$0xff] }
  0x18   :  { %296 = vmatpush3.bf16.msra.mxu1 %v295_v8  ;;  %v307_v18 = vpack.c.bf16 %v131_v17, %v130_v16  ;;  %v310_v21 = vpack.c.bf16 %v133_v20, %v132_v19  ;;  %v134_v22 = vld [vmem:[#allocation2 + $0x60] sm:$0xff]  ;;  %v136_v25 = vld [vmem:[#allocation2 + $0x70] sm:$0xff]  ;;  %v137_v26 = vld [vmem:[#allocation2 + $0x78] sm:$0xff] }
  0x19   :  { %297 = vmatprep.subr.bf16.mxu1 %v359_v1  ;;  %v313_v24 = vpack.c.bf16 %v135_v23, %v134_v22  ;;  %v316_v27 = vpack.c.bf16 %v137_v26, %v136_v25  ;;  %v231_v28 = vld [vmem:[%s419_s2] ss:$0 sm:$0xff] }
  0x1a   :  { %v234_v33 = vld [vmem:[%s421_s4] ss:$0 sm:$0xff] }
  0x1c   :  { %299 = vmatpush3.bf16.msra.mxu1 %v298_v9 }
  0x1d   :  { %300 = vmatprep.subr.bf16.mxu1 %v359_v1 }
  0x20   :  { %302 = vmatpush3.bf16.msra.mxu1 %v301_v12 }
  0x21   :  { %303 = vmatprep.subr.bf16.mxu1 %v359_v1 }
  0x24   :  { %305 = vmatpush3.bf16.msra.mxu1 %v304_v15 }
  0x25   :  { %306 = vmatprep.subr.bf16.mxu1 %v359_v1 }
  0x28   :  { %308 = vmatpush3.bf16.msra.mxu1 %v307_v18 }
  0x29   :  { %309 = vmatprep.subr.bf16.mxu1 %v359_v1 }
  0x2c   :  { %311 = vmatpush3.bf16.msra.mxu1 %v310_v21 }
  0x2d   :  { %312 = vmatprep.subr.bf16.mxu1 %v359_v1 }
  0x30   :  { %314 = vmatpush3.bf16.msra.mxu1 %v313_v24 }
  0x31   :  { %315 = vmatprep.subr.bf16.mxu1 %v359_v1 }
  0x34   :  { %317 = vmatpush3.bf16.msra.mxu1 %v316_v27 }
  0xe9   :  { %v117_v29 = vpop.f32.mrb[0].mxu0 }
  0xea   :  { %v118_v30 = vadd.f32 %v231_v28, %v117_v29  ;;  %v258_v31 = vpop.f32.mrb[1].mxu0 }
  0xec   :  { %324 = vtanh.f32 %v118_v30 }
  0xf6   :  { %v325_v32 = vpop.eup %324 }
  0xf7   :  { %292 = vmatmul.mubr.f32.vlgmr.msra.gmra.mrb[0].mxu1 %v325_v32 }
 0x1ca   :  { %v211_v34 = vpop.f32.mrb[0].mxu1 }
 0x1cb   :  { %v212_v35 = vadd.f32 %v234_v33, %v211_v34  ;;  %v293_v36 = vpop.f32.mrb[1].mxu1 }
 0x1cd   :  { %215 = vmax.xlane.f32.xlu0 %v212_v35 }
 0x25a   :  { %v216_v37 = vpop.xlane.xlu0 %215 }
 0x25b   :  { %v217_v38 = vsub.f32 %v212_v35, %v216_v37 }
 0x25d   :  { %v218_v39 = vmul.f32 1.442695, %v217_v38 }
 0x25f   :  { %326 = vpow2.f32 %v218_v39 }
 0x269   :  { %v327_v40 = vpop.eup %326 }
 0x26a   :  { %220 = vadd.xlane.f32.xlu0 %v327_v40 }
 0x2f7   :  { %v221_v41 = vpop.xlane.xlu0 %220 }
 0x2f8   :  { %328 = vrcp.f32 %v221_v41 }
 0x302   :  { %v329_v42 = vpop.eup %328 }
 0x303   :  { %v223_v43 = vmul.f32 %v329_v42, %v327_v40 }
 0x305   :  { %225 = vst.msk [vmem:[%s422_s5] sm:$0xff] %vm224_vm3, %v223_v43 }
 0x306   :  { %230 = vsyncpa [#allocation3], 1 }

</bundles_post_ra>
